<compile_context>
chip_gen: v7x
topology: tpu7x:2x2x1
jax: 0.10.0
libtpu: 0.0.40
codegen_flags: <defaults>
</compile_context>

<pallas_src>
import jax
import jax.numpy as jnp
from jax.experimental import pallas as pl
from jax.experimental.pallas import tpu as pltpu


def _epic_kernel(x_ref, w_ref, b_ref, o_ref):
    # x_ref: (tm, D)  VMEM      w_ref: (1, D) VMEM (resident)
    # b_ref: (1, 1)   SMEM      o_ref: (rt, 128) VMEM, lane-dense, tm = rt*128
    rt = o_ref.shape[0]
    d = x_ref.shape[-1]
    # Splitting the leading (row) dim is a free view; lane dim stays D.
    x = x_ref[...].reshape(rt, 128, d).astype(jnp.float32)
    w = w_ref[...].astype(jnp.float32)                 # (1, D) broadcasts over rows
    z = jnp.sum(x * w, axis=-1) + b_ref[0, 0]          # (rt, 128): VPU mul + reduce
    # softplus without materialising a zeros tile; log1p on top.
    o_ref[...] = jnp.log1p(jax.nn.softplus(z)).astype(o_ref.dtype)


def _vmem_budgets():
    """(double-buffered input budget, scoped-VMEM cap) per TPU generation."""
    try:
        phys = int(pltpu.get_tpu_info().vmem_capacity_bytes)
    except Exception:
        phys = 64 << 20                      # conservative: smallest (v7x-class) VMEM
    if phys > (64 << 20):                    # v5e / v6e: 128 MiB physical VMEM
        return 48 << 20, 96 << 20
    return 24 << 20, 40 << 20                # v7x-class: 64 MiB physical VMEM


def _choose_row_tile(n_rows, dim, itemsize, input_budget):
    """Largest row tile (multiple of 128) whose double-buffered, lane-padded
    VMEM footprint fits `input_budget`, clamped to the (128-padded) row count."""
    lanes = max(128, -(-dim // 128) * 128)   # lane-padded feature width in VMEM
    row_bytes = lanes * itemsize
    tm = max(128, (input_budget // (2 * row_bytes)) // 128 * 128)
    n_pad128 = -(-n_rows // 128) * 128
    return min(tm, n_pad128)


def epic_term_importance(x, weight, bias):
    """
    x:      (batch, seq, dim)  float32 or bfloat16
    weight: (dim, 1)           float32   (transposed nn.Linear weight)
    bias:   (1, 1)             float32
    returns (batch, seq, 1)    float32
    """
    B, S, D = x.shape
    N = B * S
    itemsize = jnp.dtype(x.dtype).itemsize

    input_budget, vmem_cap = _vmem_budgets()
    tm = _choose_row_tile(N, D, itemsize, input_budget)
    rt = tm // 128
    n_tiles = pl.cdiv(N, tm)                 # ragged last tile -> Pallas masking

    x2 = x.reshape(N, D)                     # zero-copy row-major view; NO padding copy
    w_row = weight.reshape(1, D).astype(jnp.float32)
    b2 = bias.reshape(1, 1).astype(jnp.float32)

    lanes = max(128, -(-D // 128) * 128)
    vmem_need = (2 * tm * lanes * itemsize      # double-buffered input tile (lane-padded)
                 + 2 * tm * 4                   # double-buffered lane-dense output tile
                 + 16 * lanes * 4               # resident weight row + slack
                 + (1 << 20))
    vmem_limit = int(min(max(vmem_need, 32 << 20), vmem_cap))

    out = pl.pallas_call(
        _epic_kernel,
        out_shape=jax.ShapeDtypeStruct((n_tiles * rt, 128), jnp.float32),
        grid_spec=pltpu.PrefetchScalarGridSpec(
            num_scalar_prefetch=0,
            grid=(n_tiles,),
            in_specs=[
                pl.BlockSpec((tm, D), lambda i: (i, 0)),             # big row tile
                pl.BlockSpec((1, D), lambda i: (0, 0)),              # resident weight
                pl.BlockSpec(memory_space=pltpu.MemorySpace.SMEM),   # bias scalar
            ],
            out_specs=pl.BlockSpec((rt, 128), lambda i: (i, 0)),     # lane-dense out
        ),
        compiler_params=pltpu.CompilerParams(
            dimension_semantics=("parallel",),   # independent tiles: shards over v7x's 2 TCs
            vmem_limit_bytes=vmem_limit,
        ),
        cost_estimate=pl.CostEstimate(
            flops=2 * N * D,
            transcendentals=3 * N,
            bytes_accessed=N * D * itemsize + N * 4,
        ),
    )(x2, w_row, b2)

    # Tiny (N*4 byte) slice of the lane-dense output back to the logical shape.
    return out.reshape(n_tiles * tm)[:N].reshape(B, S, 1)


def _reference(x, weight, bias):
    z = jnp.einsum("bsd,do->bso", x, weight) + bias[0, 0]
    return jnp.log1p(jax.nn.softplus(z))


if __name__ == "__main__":
    # Small shapes consistent with the module: batch=2, seq=8, dim=32
    B, S, D = 2, 8, 32
    key = jax.random.PRNGKey(0)
    kx, kw, kb = jax.random.split(key, 3)

    x = jax.random.normal(kx, (B, S, D), dtype=jnp.float32)

    # Deterministic nn.Linear-style init: U(-1/sqrt(D), 1/sqrt(D))
    bound = 1.0 / jnp.sqrt(jnp.float32(D))
    weight = jax.random.uniform(kw, (D, 1), jnp.float32, -bound, bound)
    bias = jax.random.uniform(kb, (1, 1), jnp.float32, -bound, bound)

    out = epic_term_importance(x, weight, bias)
    out = jax.block_until_ready(out)

    ref = _reference(x, weight, bias)
    assert out.shape == (B, S, 1)
    assert jnp.allclose(out, ref, atol=1e-5, rtol=1e-5), "mismatch vs reference"

    print("KERNEL_OK")
</pallas_src>

<mosaic_0001>
module attributes {stable_mosaic.version = 11 : i64} {
  func.func @_epic_kernel(%arg0: i32, %arg1: memref<128x32xf32, #tpu.memory_space<vmem>>, %arg2: memref<1x32xf32, #tpu.memory_space<vmem>>, %arg3: memref<1x1xf32, #tpu.memory_space<smem>>, %arg4: memref<1x128xf32, #tpu.memory_space<vmem>>) attributes {dimension_semantics = [#tpu.dimension_semantics<parallel>], iteration_bounds = array<i64: 1>, scalar_prefetch = 0 : i64, scratch_operands = 0 : i64, tpu.core_type = #tpu.core_type<tc>, window_params = [{transform_indices = @transform_0, window_bounds = array<i64: 128, 32>}, {pipeline_mode = #tpu.pipeline_mode<synchronous>, transform_indices = @transform_1, window_bounds = array<i64: 1, 32>}, {transform_indices = @transform_2, window_bounds = array<i64: 1, 1>}, {transform_indices = @transform_3, window_bounds = array<i64: 1, 128>}]} {
    %c0 = arith.constant 0 : index
    %c0_0 = arith.constant 0 : index
    %0 = vector.load %arg1[%c0, %c0_0] : memref<128x32xf32, #tpu.memory_space<vmem>>, vector<128x32xf32>
    %1 = vector.shape_cast %0 : vector<128x32xf32> to vector<1x128x32xf32>
    %c0_1 = arith.constant 0 : index
    %c0_2 = arith.constant 0 : index
    %2 = vector.load %arg2[%c0_1, %c0_2] : memref<1x32xf32, #tpu.memory_space<vmem>>, vector<1x32xf32>
    %3 = vector.shape_cast %2 : vector<1x32xf32> to vector<1x1x32xf32>
    %4 = vector.broadcast %3 : vector<1x1x32xf32> to vector<1x128x32xf32>
    %5 = arith.mulf %1, %4 : vector<1x128x32xf32>
    %cst = arith.constant dense<0.000000e+00> : vector<1x128xf32>
    %6 = vector.multi_reduction <add>, %5, %cst [2] : vector<1x128x32xf32> to vector<1x128xf32>
    %c0_3 = arith.constant 0 : index
    %c0_4 = arith.constant 0 : index
    %7 = memref.load %arg3[%c0_3, %c0_4] : memref<1x1xf32, #tpu.memory_space<smem>>
    %8 = vector.broadcast %7 : f32 to vector<1x128xf32>
    %9 = arith.addf %6, %8 : vector<1x128xf32>
    %cst_5 = arith.constant 0.000000e+00 : f32
    %10 = vector.broadcast %cst_5 : f32 to vector<1x128xf32>
    %11 = arith.maximumf %9, %10 : vector<1x128xf32>
    %12 = vector.broadcast %cst_5 : f32 to vector<1x128xf32>
    %13 = arith.subf %9, %12 : vector<1x128xf32>
    %14 = arith.cmpf one, %13, %13 : vector<1x128xf32>
    %15 = vector.broadcast %cst_5 : f32 to vector<1x128xf32>
    %16 = arith.addf %9, %15 : vector<1x128xf32>
    %17 = math.absf %13 : vector<1x128xf32>
    %cst_6 = arith.constant 0.000000e+00 : f32
    %18 = vector.broadcast %cst_6 : f32 to vector<1x128xf32>
    %19 = arith.subf %18, %17 : vector<1x128xf32>
    %20 = math.exp %19 : vector<1x128xf32>
    %21 = math.log1p %20 : vector<1x128xf32>
    %22 = arith.addf %11, %21 : vector<1x128xf32>
    %23 = arith.select %14, %16, %22 : vector<1x128xi1>, vector<1x128xf32>
    %24 = math.log1p %23 : vector<1x128xf32>
    %c0_7 = arith.constant 0 : index
    %c0_8 = arith.constant 0 : index
    %25 = vector.load %arg4[%c0_7, %c0_8] : memref<1x128xf32, #tpu.memory_space<vmem>>, vector<1x128xf32>
    tpu.vector_store %arg4[%c0_7, %c0_8], %24 {strides = array<i32>} : memref<1x128xf32, #tpu.memory_space<vmem>>, vector<1x128xf32>,
    return
  }
  func.func @transform_0(%arg0: i32) -> (i32, i32) {
    %c0_i32 = arith.constant 0 : i32
    %c0_i32_0 = arith.constant 0 : i32
    return %arg0, %c0_i32 : i32, i32
  }
  func.func @transform_1(%arg0: i32) -> (i32, i32) {
    %c0_i32 = arith.constant 0 : i32
    %c0_i32_0 = arith.constant 0 : i32
    %c0_i32_1 = arith.constant 0 : i32
    return %c0_i32, %c0_i32_0 : i32, i32
  }
  func.func @transform_2(%arg0: i32) -> (i32, i32) {
    %c0_i32 = arith.constant 0 : i32
    %c0_i32_0 = arith.constant 0 : i32
    %c0_i32_1 = arith.constant 0 : i32
    return %c0_i32, %c0_i32_0 : i32, i32
  }
  func.func @transform_3(%arg0: i32) -> (i32, i32) {
    %c0_i32 = arith.constant 0 : i32
    %c0_i32_0 = arith.constant 0 : i32
    return %arg0, %c0_i32 : i32, i32
  }
}

</mosaic_0001>

<bundles_post_ra>
// kernel: tpu_custom_call.1
= control target key start
LH: loop header
LB: loop body
LE: loop exit
PB: predicated region body
PF: predicated region fallthrough
CT: control target
= control target key end

     0   :  { %9 = vsyncpa [#allocation4], 0  ;;  %s1606_s0 = inlined_call_operand.hbm [shape: f32[16,32], index: 0, kind: input, shape index: {}]   ;;  %s1607_s1 = inlined_call_operand.vmem [shape: f32[1,32], index: 1, kind: input, shape index: {}]   ;;  %s1608_s2 = inlined_call_operand.<no memory space> [shape: f32[1,1], index: 2, kind: input, shape index: {}]   ;;  %s1609_s3 = inlined_call_operand.hbm [shape: f32[1,128], index: 3, kind: output, shape index: {}]  }
   0x1   :  { %10 = vsyncpa [#allocation5], 0 }
   0x2   :  { %15 = vsyncadd [#allocation4], 1792  ;;  %s861_s12 = smov [#allocation3]   ;;  %s813_s16 = scalar_lea.hbm %s1606_s0, 256 }
   0x3   :  { %s16_s13 = sshll.u32 %s861_s12, 4  ;;  %p814_p0 = scmp.ne.s32.totalorder %s1606_s0, %s813_s16  ;;  %s17_s13 = int_to_ptr.vmem [resolvable:$true] %s16_s13 }
   0x4   :  { %p817_p1 = scmp.lt.u32.totalorder %s813_s16, %s1606_s0 }
   0x6   :  { %p819_p2 = pnand %p817_p1, %p814_p0 }
   0x8   :  { %822 = shalt.err (!%p819_p2)
}
   0x9   :  { %s823_s21 = scalar_lea.vmem %s17_s13, 256  ;;  %s827_s22 = scalar_lea.vmem %s17_s13, 2048 }
   0xa   :  { %p824_p3 = scmp.ne.s32.totalorder %s17_s13, %s823_s21  ;;  %p828_p4 = scmp.lt.s32.totalorder %s17_s13, %s17_s13 }
   0xb   :  { %p829_p5 = scmp.lt.s32.totalorder %s827_s22, %s823_s21 }
   0xd   :  { %p830_p6 = por %p829_p5, %p828_p4 }
   0xf   :  { %p831_p7 = pnand %p830_p6, %p824_p3 }
  0x11   :  { %834 = shalt.err (!%p831_p7)
}
  0x12   :  { %s862_s23 = smov 128   ;;  %s863_s24 = smov 8  }
  0x13   :  { %22 = dma.hbm_to_vmem [thread:$0]  %s1606_s0, 256, %s17_s13, [#allocation4], %s862_s23, %s862_s23, %s863_s24  }
  0x14   :  { %857 = dma.done.wait [#allocation4], 2048  }
  0x15   :  { %858 = vsyncadd [#allocation4], 4294965248  ;;  %v32_v0 = vld [vmem:[#allocation3 + $0x10] sm:$0xff]  ;;  %v712_v1 = vld [vmem:[%s1607_s1] ss:$0 sm:$0xff]  ;;  %vm69_vm0 = vcmask 261120   ;;  %v919_v49 = vstv %s1608_s2 }
  0x16   :  { %v30_v2 = vld [vmem:[#allocation3] sm:$0xff]  ;;  %v55_v3 = vmul.f32 %v712_v1, %v32_v0  ;;  %v33_v5 = vld [vmem:[#allocation3 + $0x18] sm:$0xff]  ;;  %v31_v6 = vld [vmem:[#allocation3 + $0x8] sm:$0xff]  ;;  %s864_s2 = smov [#allocation6]  }
  0x17   :  { %v53_v4 = vmul.f32 %v712_v1, %v30_v2  ;;  %v56_v7 = vmul.f32 %v712_v1, %v33_v5  ;;  %v54_v8 = vmul.f32 %v712_v1, %v31_v6  ;;  %v35_v9 = vld [vmem:[#allocation3 + $0x28] sm:$0xff]  ;;  %v34_v10 = vld [vmem:[#allocation3 + $0x20] sm:$0xff]  ;;  %v37_v17 = vld [vmem:[#allocation3 + $0x38] sm:$0xff]  ;;  %s703_s29 = sshll.u32 %s864_s2, 4  ;;  %s704_s29 = int_to_ptr.vmem [resolvable:$true] %s703_s29 }
  0x18   :  { %v76_v11 = vsel %vm69_vm0, %v55_v3, 0.0  ;;  %v58_v15 = vmul.f32 %v712_v1, %v35_v9  ;;  %v57_v16 = vmul.f32 %v712_v1, %v34_v10  ;;  %v36_v18 = vld [vmem:[#allocation3 + $0x30] sm:$0xff]  ;;  %v60_v21 = vmul.f32 %v712_v1, %v37_v17  ;;  %v39_v23 = vld [vmem:[#allocation3 + $0x48] sm:$0xff]  ;;  %v38_v24 = vld [vmem:[#allocation3 + $0x40] sm:$0xff]  ;;  %s835_s30 = scalar_lea.vmem %s704_s29, 16  ;;  %s839_s4 = scalar_lea.vmem %s704_s29, 32 }
  0x19   :  { %v70_v12 = vsel %vm69_vm0, %v53_v4, 0.0  ;;  %77 = vadd.xlane.f32.xlu1 %v76_v11  ;;  %v79_v13 = vsel %vm69_vm0, %v56_v7, 0.0  ;;  %v73_v14 = vsel %vm69_vm0, %v54_v8, 0.0  ;;  %v59_v22 = vmul.f32 %v712_v1, %v36_v18  ;;  %v41_v29 = vld [vmem:[#allocation3 + $0x58] sm:$0xff]  ;;  %v40_v30 = vld [vmem:[#allocation3 + $0x50] sm:$0xff]  ;;  %v43_v35 = vld [vmem:[#allocation3 + $0x68] sm:$0xff]  ;;  %p836_p8 = scmp.ne.s32.totalorder %s704_s29, %s835_s30  ;;  %p840_p9 = scmp.lt.s32.totalorder %s704_s29, %s704_s29 }
  0x1a   :  { %71 = vadd.xlane.f32.xlu0 %v70_v12  ;;  %v85_v19 = vsel %vm69_vm0, %v58_v15, 0.0  ;;  %v82_v20 = vsel %vm69_vm0, %v57_v16, 0.0  ;;  %v91_v25 = vsel %vm69_vm0, %v60_v21, 0.0  ;;  %v62_v27 = vmul.f32 %v712_v1, %v39_v23  ;;  %v42_v36 = vld [vmem:[#allocation3 + $0x60] sm:$0xff]  ;;  %v45_v41 = vld [vmem:[#allocation3 + $0x78] sm:$0xff]  ;;  %v44_v42 = vld [vmem:[#allocation3 + $0x70] sm:$0xff]  ;;  %p841_p10 = scmp.lt.s32.totalorder %s839_s4, %s835_s30 }
  0x1b   :  { %v88_v26 = vsel %vm69_vm0, %v59_v22, 0.0  ;;  %v61_v28 = vmul.f32 %v712_v1, %v38_v24  ;;  %v64_v33 = vmul.f32 %v712_v1, %v41_v29  ;;  %v63_v34 = vmul.f32 %v712_v1, %v40_v30 }
  0x1c   :  { %v97_v31 = vsel %vm69_vm0, %v62_v27, 0.0  ;;  %v66_v39 = vmul.f32 %v712_v1, %v43_v35  ;;  %v65_v40 = vmul.f32 %v712_v1, %v42_v36  ;;  %v68_v45 = vmul.f32 %v712_v1, %v45_v41  ;;  %p842_p11 = por %p841_p10, %p840_p9 }
  0x1d   :  { %80 = vadd.xlane.f32.xlu1 %v79_v13  ;;  %v94_v32 = vsel %vm69_vm0, %v61_v28, 0.0  ;;  %v103_v37 = vsel %vm69_vm0, %v64_v33, 0.0  ;;  %v100_v38 = vsel %vm69_vm0, %v63_v34, 0.0  ;;  %v67_v46 = vmul.f32 %v712_v1, %v44_v42 }
  0x1e   :  { %74 = vadd.xlane.f32.xlu0 %v73_v14  ;;  %v109_v43 = vsel %vm69_vm0, %v66_v39, 0.0  ;;  %v106_v44 = vsel %vm69_vm0, %v65_v40, 0.0  ;;  %v115_v47 = vsel %vm69_vm0, %v68_v45, 0.0  ;;  %v584_v16 = vlaneseq  ;;  %p843_p12 = pnand %p842_p11, %p836_p8 }
  0x1f   :  { %v112_v48 = vsel %vm69_vm0, %v67_v46, 0.0 }
  0x20   :  { %v953_v22 = vand.u32 127, %v584_v16  ;;  %v959_v27 = vshrl.u32 %v584_v16, 7 }
  0x21   :  { %86 = vadd.xlane.f32.xlu1 %v85_v19 }
  0x22   :  { %83 = vadd.xlane.f32.xlu0 %v82_v20  ;;  %v962_v28 = vadd.s32 4294967280, %v953_v22  ;;  %v971_v33 = vadd.s32 4294967288, %v953_v22  ;;  %v976_v36 = vadd.s32 4294967256, %v953_v22  ;;  %v983_v39 = vadd.s32 4294967240, %v953_v22 }
  0x23   :  { %v986_v40 = vadd.s32 4294967248, %v953_v22  ;;  %v991_v42 = vadd.s32 4294967224, %v953_v22  ;;  %v588_v45 = vsub.s32 %v953_v22, %v959_v27 }
  0x24   :  { %v600_v35 = vsub.s32 %v962_v28, %v959_v27 }
  0x25   :  { %92 = vadd.xlane.f32.xlu1 %v91_v25 }
  0x26   :  { %89 = vadd.xlane.f32.xlu0 %v88_v26 }
  0x29   :  { %98 = vadd.xlane.f32.xlu1 %v97_v31 }
  0x2a   :  { %95 = vadd.xlane.f32.xlu0 %v94_v32  ;;  %v968_v32 = vadd.s32 4294967272, %v953_v22 }
  0x2c   :  { %v607_v46 = vsub.s32 %v968_v32, %v959_v27 }
  0x2d   :  { %104 = vadd.xlane.f32.xlu1 %v103_v37  ;;  %v979_v37 = vadd.s32 4294967264, %v953_v22 }
  0x2e   :  { %101 = vadd.xlane.f32.xlu0 %v100_v38 }
  0x31   :  { %110 = vadd.xlane.f32.xlu1 %v109_v43  ;;  %v994_v43 = vadd.s32 4294967232, %v953_v22 }
  0x32   :  { %107 = vadd.xlane.f32.xlu0 %v106_v44  ;;  %v997_v44 = vadd.s32 4294967216, %v953_v22 }
  0x35   :  { %116 = vadd.xlane.f32.xlu1 %v115_v47  ;;  %v593_v47 = vsub.s32 %v971_v33, %v959_v27 }
  0x36   :  { %113 = vadd.xlane.f32.xlu0 %v112_v48 }
  0xa6   :  { %v78_v50 = vpop.xlane.xlu1 %77 }
  0xa7   :  { %v72_v51 = vpop.xlane.xlu0 %71  ;;  %v922_v52 = vadd.f32 %v919_v49, %v78_v50 }
  0xa8   :  { %v925_v53 = vadd.f32 %v919_v49, %v72_v51 }
  0xa9   :  { %v186_v54 = vand.u32 2147483647, %v922_v52  ;;  %vm154_vm1 = vcmp.ne.f32.partialorder %v922_v52, %v922_v52 }
  0xaa   :  { %v184_v55 = vand.u32 2147483647, %v925_v53  ;;  %v81_v56 = vpop.xlane.xlu1 %80  ;;  %vm152_vm3 = vcmp.ne.f32.partialorder %v925_v53, %v925_v53 }
  0xab   :  { %v75_v57 = vpop.xlane.xlu0 %74  ;;  %v202_v58 = vsub.f32 0.0, %v186_v54  ;;  %v930_v59 = vadd.f32 %v919_v49, %v81_v56  ;;  %v1016_v56 = vadd.s32 4294967208, %v953_v22 }
  0xac   :  { %v933_v60 = vadd.f32 %v919_v49, %v75_v57  ;;  %v200_v61 = vsub.f32 0.0, %v184_v55 }
  0xad   :  { %v220_v62 = vmul.f32 1.442695, %v202_v58  ;;  %v187_v63 = vand.u32 2147483647, %v930_v59  ;;  %vm155_vm7 = vcmp.ne.f32.partialorder %v930_v59, %v930_v59 }
  0xae   :  { %v185_v0 = vand.u32 2147483647, %v933_v60  ;;  %v87_v1 = vpop.xlane.xlu1 %86  ;;  %v216_v3 = vmul.f32 1.442695, %v200_v61  ;;  %vm153_vm5 = vcmp.ne.f32.partialorder %v933_v60, %v933_v60 }
  0xaf   :  { %v84_v2 = vpop.xlane.xlu0 %83  ;;  %v941_v6 = vadd.f32 %v919_v49, %v87_v1  ;;  %717 = vpow2.f32 %v220_v62  ;;  %v203_v7 = vsub.f32 0.0, %v187_v63 }
  0xb0   :  { %v938_v4 = vadd.f32 %v919_v49, %v84_v2  ;;  %v201_v5 = vsub.f32 0.0, %v185_v0  ;;  %719 = vpow2.f32 %v216_v3 }
  0xb1   :  { %v189_v10 = vand.u32 2147483647, %v941_v6  ;;  %v222_v12 = vmul.f32 1.442695, %v203_v7  ;;  %v136_v7 = vmax.f32 %v925_v53, 0.0  ;;  %vm157_vm11 = vcmp.ne.f32.partialorder %v941_v6, %v941_v6 }
  0xb2   :  { %v218_v8 = vmul.f32 1.442695, %v201_v5  ;;  %v188_v9 = vand.u32 2147483647, %v938_v4  ;;  %v93_v11 = vpop.xlane.xlu1 %92  ;;  %v138_v5 = vmax.f32 %v922_v52, 0.0  ;;  %vm156_vm10 = vcmp.ne.f32.partialorder %v938_v4, %v938_v4 }
  0xb3   :  { %v205_v14 = vsub.f32 0.0, %v189_v10  ;;  %v946_v15 = vadd.f32 %v919_v49, %v93_v11  ;;  %v90_v34 = vpop.xlane.xlu0 %89 }
  0xb4   :  { %721 = vpow2.f32 %v218_v8  ;;  %v204_v13 = vsub.f32 0.0, %v188_v9  ;;  %v1006_v48 = vadd.f32 %v919_v49, %v90_v34 }
  0xb5   :  { %723 = vpow2.f32 %v222_v12  ;;  %v226_v19 = vmul.f32 1.442695, %v205_v14  ;;  %v191_v20 = vand.u32 2147483647, %v946_v15  ;;  %vm159_vm14 = vcmp.ne.f32.partialorder %v946_v15, %v946_v15 }
  0xb6   :  { %v224_v17 = vmul.f32 1.442695, %v204_v13  ;;  %v190_v9 = vand.u32 2147483647, %v1006_v48  ;;  %v99_v10 = vpop.xlane.xlu1 %98 }
  0xb7   :  { %v207_v26 = vsub.f32 0.0, %v191_v20  ;;  %v96_v62 = vpop.xlane.xlu0 %95  ;;  %v139_v20 = vmax.f32 %v930_v59, 0.0 }
  0xb8   :  { %725 = vpow2.f32 %v224_v17  ;;  %v1036_v14 = vadd.f32 %v919_v49, %v96_v62 }
  0xb9   :  { %v948_v18 = vpop.eup %717  ;;  %727 = vpow2.f32 %v226_v19  ;;  %v230_v31 = vmul.f32 1.442695, %v207_v26  ;;  %v137_v26 = vmax.f32 %v933_v60, 0.0 }
  0xba   :  { %v951_v21 = vpop.eup %719  ;;  %v266_v23 = vadd.f32 1.0, %v948_v18  ;;  %v269_v51 = vmul.f32 -0.5, %v948_v18  ;;  %v272_v17 = vand.u32 2147483647, %v948_v18  ;;  %v192_v16 = vand.u32 2147483647, %v1036_v14 }
  0xbb   :  { %v248_v25 = vadd.f32 1.0, %v951_v21  ;;  %v251_v57 = vmul.f32 -0.5, %v951_v21 }
  0xbc   :  { %729 = vlog2.f32 %v266_v23  ;;  %v270_v12 = vadd.f32 1.0, %v269_v51  ;;  %v206_v51 = vsub.f32 0.0, %v190_v9  ;;  %vm1055_vm2 = vcmp.lt.f32.partialorder %v272_v17, 0.0004427343 }
  0xbd   :  { %731 = vlog2.f32 %v248_v25  ;;  %v252_v19 = vadd.f32 1.0, %v251_v57  ;;  %v254_v25 = vand.u32 2147483647, %v951_v21 }
  0xbe   :  { %v956_v24 = vpop.eup %721  ;;  %v271_v57 = vmul.f32 %v948_v18, %v270_v12  ;;  %v228_v1 = vmul.f32 1.442695, %v206_v51 }
  0xbf   :  { %v257_v29 = vadd.f32 1.0, %v956_v24  ;;  %v965_v30 = vpop.eup %723  ;;  %v260_v13 = vmul.f32 -0.5, %v956_v24  ;;  %v263_v9 = vand.u32 2147483647, %v956_v24  ;;  %vm1066_vm4 = vcmp.lt.f32.partialorder %v254_v25, 0.0004427343 }
  0xc0   :  { %v275_v38 = vadd.f32 1.0, %v965_v30 }
  0xc1   :  { %733 = vlog2.f32 %v257_v29  ;;  %v1045_v29 = vadd.f32 %v919_v49, %v99_v10  ;;  %v281_v10 = vand.u32 2147483647, %v965_v30  ;;  %vm1080_vm6 = vcmp.lt.f32.partialorder %v263_v9, 0.0004427343 }
  0xc2   :  { %v988_v41 = vpop.eup %725  ;;  %735 = vpow2.f32 %v230_v31 }
  0xc3   :  { %v1008_v50 = vpop.eup %727  ;;  %737 = vlog2.f32 %v275_v38  ;;  %v284_v58 = vadd.f32 1.0, %v988_v41  ;;  %v141_v38 = vmax.f32 %v941_v6, 0.0  ;;  %v193_v17 = vand.u32 2147483647, %v1045_v29 }
  0xc4   :  { %v293_v8 = vadd.f32 1.0, %v1008_v50  ;;  %v287_v25 = vmul.f32 -0.5, %v988_v41  ;;  %vm1100_vm8 = vcmp.lt.f32.partialorder %v281_v10, 0.0004427343 }
  0xc5   :  { %739 = vlog2.f32 %v284_v58  ;;  %v278_v58 = vmul.f32 -0.5, %v965_v30  ;;  %v209_v61 = vsub.f32 0.0, %v193_v17 }
  0xc6   :  { %v730_v3 = vpop.eup %729  ;;  %741 = vlog2.f32 %v293_v8  ;;  %v253_v8 = vmul.f32 %v951_v21, %v252_v19  ;;  %v296_v21 = vmul.f32 -0.5, %v1008_v50 }
  0xc7   :  { %v732_v11 = vpop.eup %731  ;;  %v268_v23 = vmul.f32 0.6931472, %v730_v3  ;;  %v261_v3 = vadd.f32 1.0, %v260_v13  ;;  %v279_v63 = vadd.f32 1.0, %v278_v58 }
  0xc8   :  { %v250_v34 = vmul.f32 0.6931472, %v732_v11  ;;  %v140_v11 = vmax.f32 %v938_v4, 0.0 }
  0xc9   :  { %v274_v18 = vsel %vm1055_vm2, %v271_v57, %v268_v23  ;;  %v262_v23 = vmul.f32 %v956_v24, %v261_v3  ;;  %v297_v3 = vadd.f32 1.0, %v296_v21  ;;  %v280_v9 = vmul.f32 %v965_v30, %v279_v63 }
  0xca   :  { %v256_v0 = vsel %vm1066_vm4, %v253_v8, %v250_v34  ;;  %v394_v57 = vadd.f32 %v274_v18, %v138_v5  ;;  %v1085_v34 = vadd.s32 4294967200, %v953_v22  ;;  %v143_v5 = vmax.f32 %v946_v15, 0.0 }
  0xcb   :  { %v734_v31 = vpop.eup %733  ;;  %v392_v51 = vadd.f32 %v256_v0, %v136_v7  ;;  %v288_v18 = vadd.f32 1.0, %v287_v25  ;;  %v299_v25 = vand.u32 2147483647, %v1008_v50  ;;  %vm602_vm4 = vcmask 195712  }
  0xcc   :  { %v1048_v62 = vpop.eup %735  ;;  %v259_v13 = vmul.f32 0.6931472, %v734_v31  ;;  %v208_v31 = vsub.f32 0.0, %v192_v16  ;;  %v290_v16 = vand.u32 2147483647, %v988_v41 }
  0xcd   :  { %v738_v2 = vpop.eup %737  ;;  %v311_v19 = vadd.f32 1.0, %v1048_v62  ;;  %v1109_v30 = vsel %vm152_vm3, %v925_v53, %v392_v51  ;;  %v289_v10 = vmul.f32 %v988_v41, %v288_v18  ;;  %v314_v51 = vmul.f32 -0.5, %v1048_v62 }
  0xce   :  { %v277_v58 = vmul.f32 0.6931472, %v738_v2  ;;  %v265_v8 = vsel %vm1080_vm6, %v262_v23, %v259_v13  ;;  %v232_v0 = vmul.f32 1.442695, %v208_v31  ;;  %v105_v2 = vpop.xlane.xlu1 %104  ;;  %v1098_v13 = vsel %vm154_vm1, %v922_v52, %v394_v57 }
  0xcf   :  { %v740_v24 = vpop.eup %739  ;;  %743 = vlog2.f32 %v311_v19  ;;  %v393_v21 = vadd.f32 %v265_v8, %v137_v26  ;;  %v142_v19 = vmax.f32 %v1006_v48, 0.0  ;;  %v234_v23 = vmul.f32 1.442695, %v209_v61 }
  0xd0   :  { %745 = vpow2.f32 %v228_v1  ;;  %v742_v7 = vpop.eup %741  ;;  %v283_v63 = vsel %vm1100_vm8, %v280_v9, %v277_v58  ;;  %v286_v1 = vmul.f32 0.6931472, %v740_v24  ;;  %v298_v52 = vmul.f32 %v1008_v50, %v297_v3  ;;  %v102_v3 = vpop.xlane.xlu0 %101 }
  0xd1   :  { %vm1115_vm9 = vcmp.lt.f32.partialorder %v290_v16, 0.0004427343  ;;  %v1120_v26 = vadd.f32 %v919_v49, %v105_v2  ;;  %v442_v57 = vadd.f32 1.0, %v1098_v13  ;;  %v295_v53 = vmul.f32 0.6931472, %v742_v7 }
  0xd2   :  { %747 = vpow2.f32 %v232_v0  ;;  %v424_v61 = vadd.f32 1.0, %v1109_v30  ;;  %v395_v50 = vadd.f32 %v283_v63, %v139_v20  ;;  %v1133_v12 = vsel %vm153_vm5, %v933_v60, %v393_v21  ;;  %v111_v2 = vpop.xlane.xlu1 %110 }
  0xd3   :  { %v445_v58 = vmul.f32 -0.5, %v1098_v13  ;;  %v292_v41 = vsel %vm1115_vm9, %v289_v10, %v286_v1  ;;  %v317_v8 = vand.u32 2147483647, %v1048_v62  ;;  %749 = vpow2.f32 %v234_v23 }
  0xd4   :  { %v427_v20 = vmul.f32 -0.5, %v1109_v30  ;;  %vm1143_vm12 = vcmp.lt.f32.partialorder %v299_v25, 0.0004427343  ;;  %v195_v60 = vand.u32 2147483647, %v1120_v26  ;;  %751 = vlog2.f32 %v442_v57 }
  0xd5   :  { %v433_v9 = vadd.f32 1.0, %v1133_v12  ;;  %v301_v18 = vsel %vm1143_vm12, %v298_v52, %v295_v53  ;;  %753 = vlog2.f32 %v424_v61  ;;  %v1158_v17 = vsel %vm155_vm7, %v930_v59, %v395_v50 }
  0xd6   :  { %v396_v21 = vadd.f32 %v292_v41, %v140_v11  ;;  %v446_v23 = vadd.f32 1.0, %v445_v58  ;;  %v315_v52 = vadd.f32 1.0, %v314_v51  ;;  %vm1165_vm13 = vcmp.lt.f32.partialorder %v317_v8, 0.0004427343 }
  0xd7   :  { %v1170_v31 = vadd.f32 %v919_v49, %v102_v3  ;;  %v428_v57 = vadd.f32 1.0, %v427_v20  ;;  %v397_v59 = vadd.f32 %v301_v18, %v141_v38  ;;  %v211_v53 = vsub.f32 0.0, %v195_v60 }
  0xd8   :  { %v1175_v11 = vadd.f32 %v919_v49, %v111_v2  ;;  %v448_v10 = vand.u32 2147483647, %v1098_v13  ;;  %v451_v61 = vadd.f32 1.0, %v1158_v17  ;;  %755 = vlog2.f32 %v433_v9  ;;  %v108_v9 = vpop.xlane.xlu0 %107 }
  0xd9   :  { %v744_v7 = vpop.eup %743  ;;  %v430_v51 = vand.u32 2147483647, %v1109_v30  ;;  %v1184_v58 = vsel %vm156_vm10, %v938_v4, %v396_v21  ;;  %v238_v41 = vmul.f32 1.442695, %v211_v53  ;;  %v1190_v20 = vmul.f32 %v446_v23, %v1098_v13 }
  0xda   :  { %v1163_v1 = vpop.eup %745  ;;  %v313_v50 = vmul.f32 0.6931472, %v744_v7  ;;  %v454_v24 = vmul.f32 -0.5, %v1158_v17  ;;  %v316_v60 = vmul.f32 %v1048_v62, %v315_v52  ;;  %v1196_v18 = vmul.f32 %v428_v57, %v1109_v30 }
  0xdb   :  { %v302_v38 = vadd.f32 1.0, %v1163_v1  ;;  %v436_v4 = vmul.f32 -0.5, %v1133_v12  ;;  %v1203_v2 = vsel %vm157_vm11, %v941_v6, %v397_v59  ;;  %757 = vpow2.f32 %v238_v41 }
  0xdc   :  { %v1187_v8 = vpop.eup %747  ;;  %vm1209_vm15 = vcmp.lt.f32.partialorder %v448_v10, 0.0004427343  ;;  %759 = vlog2.f32 %v451_v61  ;;  %v460_v30 = vadd.f32 1.0, %v1184_v58  ;;  %v319_v7 = vsel %vm1165_vm13, %v316_v60, %v313_v50 }
  0xdd   :  { %v1207_v13 = vpop.eup %749  ;;  %v194_v21 = vand.u32 2147483647, %v1170_v31  ;;  %vm1217_vm0 = vcmp.lt.f32.partialorder %v430_v51, 0.0004427343  ;;  %761 = vlog2.f32 %v302_v38  ;;  %v320_v23 = vadd.f32 1.0, %v1187_v8 }
  0xde   :  { %v197_v52 = vand.u32 2147483647, %v1175_v11  ;;  %v1224_v57 = vadd.f32 %v919_v49, %v108_v9  ;;  %v752_v59 = vpop.eup %751  ;;  %v455_v53 = vadd.f32 1.0, %v454_v24  ;;  %v457_v10 = vand.u32 2147483647, %v1158_v17 }
  0xdf   :  { %v472_v25 = vmul.f32 -0.5, %v1203_v2  ;;  %v210_v61 = vsub.f32 0.0, %v194_v21  ;;  %v754_v50 = vpop.eup %753  ;;  %v437_v51 = vadd.f32 1.0, %v436_v4  ;;  %v439_v41 = vand.u32 2147483647, %v1133_v12 }
  0xe0   :  { %v329_v38 = vadd.f32 1.0, %v1207_v13  ;;  %v213_v60 = vsub.f32 0.0, %v197_v52  ;;  %763 = vlog2.f32 %v460_v30  ;;  %v399_v16 = vadd.f32 %v319_v7, %v143_v5 }
  0xe1   :  { %v236_v9 = vmul.f32 1.442695, %v210_v61  ;;  %v196_v3 = vand.u32 2147483647, %v1224_v57  ;;  %v444_v24 = vmul.f32 0.6931472, %v752_v59  ;;  %765 = vlog2.f32 %v320_v23 }
  0xe2   :  { %v469_v54 = vadd.f32 1.0, %v1203_v2  ;;  %v463_v0 = vmul.f32 -0.5, %v1184_v58  ;;  %v756_v21 = vpop.eup %755  ;;  %v426_v4 = vmul.f32 0.6931472, %v754_v50  ;;  %v473_v55 = vadd.f32 1.0, %v472_v25 }
  0xe3   :  { %767 = vpow2.f32 %v236_v9  ;;  %v242_v63 = vmul.f32 1.442695, %v213_v60  ;;  %v1236_v52 = vmul.f32 %v455_v53, %v1158_v17  ;;  %vm1238_vm1 = vcmp.lt.f32.partialorder %v439_v41, 0.0004427343  ;;  %v117_v53 = vpop.xlane.xlu1 %116 }
  0xe4   :  { %769 = vlog2.f32 %v329_v38  ;;  %v212_v5 = vsub.f32 0.0, %v196_v3  ;;  %vm1242_vm2 = vcmp.lt.f32.partialorder %v457_v10, 0.0004427343  ;;  %v475_v23 = vand.u32 2147483647, %v1203_v2 }
  0xe5   :  { %v1251_v59 = vsel %vm159_vm14, %v946_v15, %v399_v16  ;;  %v305_v17 = vmul.f32 -0.5, %v1163_v1  ;;  %771 = vpow2.f32 %v242_v63  ;;  %v1254_v25 = vpop.eup %757  ;;  %v450_v3 = vsel %vm1209_vm15, %v1190_v20, %v444_v24 }
  0xe6   :  { %vm595_vm3 = vcmask 130112   ;;  %v435_v10 = vmul.f32 0.6931472, %v756_v21  ;;  %v438_v61 = vmul.f32 %v437_v51, %v1133_v12  ;;  %v464_v50 = vadd.f32 1.0, %v463_v0  ;;  %v760_v41 = vpop.eup %759 }
  0xe7   :  { %v432_v15 = vsel %vm1217_vm0, %v1196_v18, %v426_v4  ;;  %773 = vlog2.f32 %v469_v54  ;;  %v1264_v16 = vmul.f32 %v473_v55, %v1203_v2  ;;  %v466_v63 = vand.u32 2147483647, %v1184_v58  ;;  %v762_v38 = vpop.eup %761  ;;  %v114_v4 = vpop.xlane.xlu0 %113 }
  0xe8   :  { %v487_v62 = vadd.f32 1.0, %v1251_v59  ;;  %v490_v20 = vmul.f32 -0.5, %v1251_v59  ;;  %v240_v60 = vmul.f32 1.442695, %v212_v5  ;;  %v1270_v12 = vadd.f32 %v919_v49, %v117_v53 }
  0xe9   :  { %v1275_v0 = vrot.slane %v450_v3, %v600_v35  ;;  %v306_v54 = vadd.f32 1.0, %v305_v17  ;;  %v323_v55 = vmul.f32 -0.5, %v1187_v8  ;;  %v347_v18 = vadd.f32 1.0, %v1254_v25 }
  0xea   :  { %v453_v2 = vmul.f32 0.6931472, %v760_v41  ;;  %v441_v6 = vsel %vm1238_vm1, %v438_v61, %v435_v10  ;;  %v1282_v51 = vmul.f32 %v464_v50, %v1184_v58  ;;  %v308_v9 = vand.u32 2147483647, %v1163_v1  ;;  %v764_v24 = vpop.eup %763 }
  0xeb   :  { %v589_v28 = vrot.slane %v432_v15, %v588_v45  ;;  %v304_v35 = vmul.f32 0.6931472, %v762_v38  ;;  %v332_v21 = vmul.f32 -0.5, %v1207_v13  ;;  %775 = vpow2.f32 %v240_v60  ;;  %v766_v5 = vpop.eup %765 }
  0xec   :  { %777 = vlog2.f32 %v487_v62  ;;  %v491_v17 = vadd.f32 1.0, %v490_v20  ;;  %v493_v30 = vand.u32 2147483647, %v1251_v59  ;;  %v199_v58 = vand.u32 2147483647, %v1270_v12 }
  0xed   :  { %v1291_v53 = vpop.eup %767  ;;  %v594_v3 = vrot.slane %v441_v6, %v593_v47  ;;  %vm1296_vm5 = vcmp.lt.f32.partialorder %v466_v63, 0.0004427343  ;;  %vm158_vm6 = vcmp.ne.f32.partialorder %v1006_v48, %v1006_v48  ;;  %v307_v10 = vmul.f32 %v1163_v1, %v306_v54 }
  0xee   :  { %v324_v61 = vadd.f32 1.0, %v323_v55  ;;  %779 = vlog2.f32 %v347_v18  ;;  %v770_v50 = vpop.eup %769  ;;  %v459_v41 = vsel %vm1242_vm2, %v1236_v52, %v453_v2  ;;  %vm1306_vm7 = vcmp.lt.f32.partialorder %v308_v9, 0.0004427343 }
  0xef   :  { %v338_v33 = vadd.f32 1.0, %v1291_v53  ;;  %v1312_v47 = vadd.f32 %v919_v49, %v114_v4  ;;  %v1314_v63 = vpop.eup %771  ;;  %vm1316_vm8 = vcmp.lt.f32.partialorder %v475_v23, 0.0004427343  ;;  %v310_v38 = vsel %vm1306_vm7, %v307_v10, %v304_v35 }
  0xf0   :  { %v333_v7 = vadd.f32 1.0, %v332_v21  ;;  %v326_v52 = vand.u32 2147483647, %v1187_v8  ;;  %v215_v62 = vsub.f32 0.0, %v199_v58  ;;  %v335_v20 = vand.u32 2147483647, %v1207_v13 }
  0xf1   :  { %v322_v60 = vmul.f32 0.6931472, %v766_v5  ;;  %781 = vlog2.f32 %v338_v33  ;;  %v365_v49 = vadd.f32 1.0, %v1314_v63  ;;  %v774_v54 = vpop.eup %773  ;;  %v596_v55 = vsel %vm595_vm3, %v594_v3, %v589_v28 }
  0xf2   :  { %v462_v23 = vmul.f32 0.6931472, %v764_v24  ;;  %v325_v18 = vmul.f32 %v1187_v8, %v324_v61  ;;  %v246_v2 = vmul.f32 1.442695, %v215_v62  ;;  %v398_v6 = vadd.f32 %v310_v38, %v142_v19 }
  0xf3   :  { %v331_v9 = vmul.f32 0.6931472, %v770_v50  ;;  %vm160_vm9 = vcmp.ne.f32.partialorder %v1036_v14, %v1036_v14  ;;  %783 = vlog2.f32 %v365_v49  ;;  %v198_v35 = vand.u32 2147483647, %v1312_v47 }
  0xf4   :  { %v334_v21 = vmul.f32 %v1207_v13, %v333_v7  ;;  %vm1333_vm10 = vcmp.lt.f32.partialorder %v326_v52, 0.0004427343  ;;  %v341_v24 = vmul.f32 -0.5, %v1291_v53  ;;  %785 = vpow2.f32 %v246_v2 }
  0xf5   :  { %v471_v8 = vmul.f32 0.6931472, %v774_v54  ;;  %vm609_vm11 = vcmask 261312   ;;  %v328_v19 = vsel %vm1333_vm10, %v325_v18, %v322_v60  ;;  %v350_v28 = vmul.f32 -0.5, %v1254_v25  ;;  %v1341_v58 = vpop.eup %775 }
  0xf6   :  { %v214_v5 = vsub.f32 0.0, %v198_v35  ;;  %v608_v13 = vrot.slane %v459_v41, %v607_v46  ;;  %v603_v3 = vsel %vm602_vm4, %v1275_v0, %v596_v55  ;;  %v1349_v10 = vmul.f32 %v491_v17, %v1251_v59  ;;  %v778_v50 = vpop.eup %777 }
  0xf7   :  { %vm161_vm12 = vcmp.ne.f32.partialorder %v1045_v29, %v1045_v29  ;;  %vm1353_vm13 = vcmp.lt.f32.partialorder %v335_v20, 0.0004427343  ;;  %v468_v15 = vsel %vm1296_vm5, %v1282_v51, %v462_v23  ;;  %v1364_v32 = vsel %vm158_vm6, %v1006_v48, %v398_v6 }
  0xf8   :  { %v337_v46 = vsel %vm1353_vm13, %v334_v21, %v331_v9  ;;  %v356_v0 = vadd.f32 1.0, %v1341_v58  ;;  %v780_v17 = vpop.eup %779  ;;  %vm616_vm14 = vcmask 326912   ;;  %v1642_v41 = vmax.f32 %v1036_v14, 0.0 }
  0xf9   :  { %v342_v38 = vadd.f32 1.0, %v341_v24  ;;  %v368_v45 = vmul.f32 -0.5, %v1314_v63  ;;  %v244_v51 = vmul.f32 1.442695, %v214_v5  ;;  %v477_v7 = vsel %vm1316_vm8, %v1264_v16, %v471_v8 }
  0xfa   :  { %v400_v33 = vadd.f32 %v328_v19, %v1642_v41  ;;  %v351_v48 = vadd.f32 1.0, %v350_v28  ;;  %v344_v52 = vand.u32 2147483647, %v1291_v53  ;;  %787 = vlog2.f32 %v356_v0 }
  0xfb   :  { %vm1378_vm15 = vcmp.lt.f32.partialorder %v493_v30, 0.0004427343  ;;  %v478_v20 = vadd.f32 1.0, %v1364_v32  ;;  %v353_v60 = vand.u32 2147483647, %v1254_v25  ;;  %v146_v49 = vmax.f32 %v1170_v31, 0.0  ;;  %v782_v54 = vpop.eup %781 }
  0xfc   :  { %789 = vpow2.f32 %v244_v51  ;;  %v1645_v16 = vsub.s32 %v979_v37, %v959_v27  ;;  %v489_v55 = vmul.f32 0.6931472, %v778_v50  ;;  %v1646_v23 = vmax.f32 %v1045_v29, 0.0 }
  0xfd   :  { %v349_v30 = vmul.f32 0.6931472, %v780_v17  ;;  %v1394_v18 = vsel %vm160_vm9, %v1036_v14, %v400_v33  ;;  %v340_v2 = vmul.f32 0.6931472, %v782_v54  ;;  %v343_v6 = vmul.f32 %v1291_v53, %v342_v38  ;;  %v784_v35 = vpop.eup %783 }
  0xfe   :  { %v615_v1 = vrot.slane %v468_v15, %v1645_v16  ;;  %v401_v59 = vadd.f32 %v337_v46, %v1646_v23  ;;  %v369_v9 = vadd.f32 1.0, %v368_v45  ;;  %vm623_vm0 = vcmask 392512   ;;  %v1402_v24 = vpop.eup %785 }
  0xff   :  { %vm163_vm1 = vcmp.ne.f32.partialorder %v1120_v26, %v1120_v26  ;;  %v352_v37 = vmul.f32 %v1254_v25, %v351_v48  ;;  %vm345_vm2 = vcmp.lt.f32.partialorder %v344_v52, 0.0004427343  ;;  %v371_v21 = vand.u32 2147483647, %v1314_v63 }
 0x100   :  { %v359_v4 = vmul.f32 -0.5, %v1341_v58  ;;  %791 = vlog2.f32 %v478_v20  ;;  %vm1404_vm3 = vcmp.lt.f32.partialorder %v353_v60, 0.0004427343  ;;  %v346_v53 = vsel %vm345_vm2, %v343_v6, %v340_v2 }
 0x101   :  { %v367_v8 = vmul.f32 0.6931472, %v784_v35  ;;  %v1412_v19 = vsel %vm161_vm12, %v1045_v29, %v401_v59  ;;  %v355_v25 = vsel %vm1404_vm3, %v352_v37, %v349_v30  ;;  %v402_v28 = vadd.f32 %v346_v53, %v146_v49 }
 0x102   :  { %v383_v5 = vadd.f32 1.0, %v1402_v24  ;;  %v1649_v61 = vsub.s32 %v976_v36, %v959_v27  ;;  %v610_v15 = vsel %vm609_vm11, %v608_v13, %v603_v3  ;;  %v496_v46 = vadd.f32 1.0, %v1394_v18 }
 0x103   :  { %v370_v0 = vmul.f32 %v1314_v63, %v369_v9  ;;  %vm162_vm4 = vcmp.ne.f32.partialorder %v1170_v31, %v1170_v31  ;;  %vm1425_vm5 = vcmp.lt.f32.partialorder %v371_v21, 0.0004427343  ;;  %v360_v17 = vadd.f32 1.0, %v359_v4 }
 0x104   :  { %v622_v50 = vrot.slane %v477_v7, %v1649_v61  ;;  %793 = vlog2.f32 %v383_v5  ;;  %v505_v41 = vadd.f32 1.0, %v1412_v19  ;;  %v1652_v36 = vmax.f32 %v1120_v26, 0.0  ;;  %v788_v63 = vpop.eup %787 }
 0x105   :  { %v373_v13 = vsel %vm1425_vm5, %v370_v0, %v367_v8  ;;  %v362_v3 = vand.u32 2147483647, %v1341_v58  ;;  %v617_v38 = vsel %vm616_vm14, %v615_v1, %v610_v15  ;;  %v495_v45 = vsel %vm1378_vm15, %v1349_v10, %v489_v55 }
 0x106   :  { %v403_v33 = vadd.f32 %v355_v25, %v1652_v36  ;;  %v1440_v51 = vsel %vm162_vm4, %v1170_v31, %v402_v28  ;;  %v149_v7 = vmax.f32 %v1175_v11, 0.0  ;;  %v1443_v48 = vpop.eup %789  ;;  %v481_v52 = vmul.f32 -0.5, %v1364_v32 }
 0x107   :  { %795 = vlog2.f32 %v496_v46  ;;  %v148_v20 = vmax.f32 %v1224_v57, 0.0  ;;  %v386_v60 = vmul.f32 -0.5, %v1402_v24  ;;  %v358_v54 = vmul.f32 0.6931472, %v788_v63 }
 0x108   :  { %v405_v49 = vadd.f32 %v373_v13, %v149_v7  ;;  %v361_v16 = vmul.f32 %v1341_v58, %v360_v17  ;;  %v374_v10 = vadd.f32 1.0, %v1443_v48  ;;  %797 = vlog2.f32 %v505_v41 }
 0x109   :  { %v1454_v31 = vsel %vm163_vm1, %v1120_v26, %v403_v33  ;;  %v514_v62 = vadd.f32 1.0, %v1440_v51  ;;  %vm363_vm6 = vcmp.lt.f32.partialorder %v362_v3, 0.0004427343  ;;  %vm165_vm7 = vcmp.ne.f32.partialorder %v1175_v11, %v1175_v11 }
 0x10a   :  { %v364_v1 = vsel %vm363_vm6, %v361_v16, %v358_v54  ;;  %799 = vlog2.f32 %v374_v10  ;;  %v1460_v55 = vadd.s32 4294967192, %v953_v22  ;;  %v792_v58 = vpop.eup %791  ;;  %v1653_v23 = vsub.s32 %v983_v39, %v959_v27 }
 0x10b   :  { %v1468_v26 = vsel %vm623_vm0, %v622_v50, %v617_v38  ;;  %v404_v30 = vadd.f32 %v364_v1, %v148_v20  ;;  %v387_v2 = vadd.f32 1.0, %v386_v60  ;;  %v523_v6 = vadd.f32 1.0, %v1454_v31 }
 0x10c   :  { %v1465_v59 = vrot.slane %v495_v45, %v1653_v23  ;;  %v1472_v9 = vsel %vm165_vm7, %v1175_v11, %v405_v49  ;;  %vm164_vm8 = vcmp.ne.f32.partialorder %v1224_v57, %v1224_v57  ;;  %v389_v35 = vand.u32 2147483647, %v1402_v24 }
 0x10d   :  { %v482_v37 = vadd.f32 1.0, %v481_v52  ;;  %801 = vlog2.f32 %v514_v62  ;;  %v1478_v39 = vsel %vm164_vm8, %v1224_v57, %v404_v30  ;;  %v377_v21 = vmul.f32 -0.5, %v1443_v48 }
 0x10e   :  { %v794_v4 = vpop.eup %793  ;;  %v484_v14 = vand.u32 2147483647, %v1364_v32  ;;  %v508_v53 = vmul.f32 -0.5, %v1412_v19  ;;  %v499_v11 = vmul.f32 -0.5, %v1394_v18  ;;  %v532_v8 = vadd.f32 1.0, %v1478_v39 }
 0x10f   :  { %vm630_vm9 = vcmask 458112   ;;  %v480_v25 = vmul.f32 0.6931472, %v792_v58  ;;  %v541_v28 = vadd.f32 1.0, %v1472_v9  ;;  %v385_v5 = vmul.f32 0.6931472, %v794_v4 }
 0x110   :  { %v388_v61 = vmul.f32 %v1402_v24, %v387_v2  ;;  %v502_v57 = vand.u32 2147483647, %v1394_v18  ;;  %803 = vlog2.f32 %v523_v6  ;;  %v151_v50 = vmax.f32 %v1270_v12, 0.0 }
 0x111   :  { %vm390_vm10 = vcmp.lt.f32.partialorder %v389_v35, 0.0004427343  ;;  %v796_v15 = vpop.eup %795  ;;  %v483_v46 = vmul.f32 %v482_v37, %v1364_v32  ;;  %805 = vlog2.f32 %v532_v8  ;;  %v378_v29 = vadd.f32 1.0, %v377_v21 }
 0x112   :  { %v391_v0 = vsel %vm390_vm10, %v388_v61, %v385_v5  ;;  %vm1490_vm11 = vcmp.lt.f32.partialorder %v484_v14, 0.0004427343  ;;  %v500_v41 = vadd.f32 1.0, %v499_v11  ;;  %v380_v24 = vand.u32 2147483647, %v1443_v48  ;;  %v798_v33 = vpop.eup %797 }
 0x113   :  { %v407_v36 = vadd.f32 %v391_v0, %v151_v50  ;;  %v486_v13 = vsel %vm1490_vm11, %v483_v46, %v480_v25  ;;  %v511_v3 = vand.u32 2147483647, %v1412_v19  ;;  %807 = vlog2.f32 %v541_v28 }
 0x114   :  { %vm167_vm12 = vcmp.ne.f32.partialorder %v1270_v12, %v1270_v12  ;;  %vm637_vm13 = vcmask 523712   ;;  %v800_v32 = vpop.eup %799  ;;  %v509_v63 = vadd.f32 1.0, %v508_v53  ;;  %vm1500_vm14 = vcmp.lt.f32.partialorder %v502_v57, 0.0004427343 }
 0x115   :  { %v517_v45 = vmul.f32 -0.5, %v1440_v51  ;;  %v1506_v7 = vsel %vm167_vm12, %v1270_v12, %v407_v36  ;;  %v498_v52 = vmul.f32 0.6931472, %v796_v15  ;;  %v376_v60 = vmul.f32 0.6931472, %v800_v32 }
 0x116   :  { %v559_v20 = vadd.f32 1.0, %v1506_v7  ;;  %v379_v49 = vmul.f32 %v1443_v48, %v378_v29  ;;  %vm644_vm15 = vcmask 589312   ;;  %v1658_v54 = vsub.s32 %v986_v40, %v959_v27 }
 0x117   :  { %v501_v10 = vmul.f32 %v500_v41, %v1394_v18  ;;  %v150_v62 = vmax.f32 %v1312_v47, 0.0  ;;  %vm381_vm0 = vcmp.lt.f32.partialorder %v380_v24, 0.0004427343  ;;  %v802_v1 = vpop.eup %801  ;;  %v507_v58 = vmul.f32 0.6931472, %v798_v33 }
 0x118   :  { %v629_v16 = vrot.slane %v486_v13, %v1658_v54  ;;  %v526_v12 = vmul.f32 -0.5, %v1454_v31  ;;  %809 = vlog2.f32 %v559_v20  ;;  %v382_v23 = vsel %vm381_vm0, %v379_v49, %v376_v60 }
 0x119   :  { %v518_v30 = vadd.f32 1.0, %v517_v45  ;;  %v520_v2 = vand.u32 2147483647, %v1440_v51  ;;  %v535_v48 = vmul.f32 -0.5, %v1478_v39  ;;  %v406_v6 = vadd.f32 %v382_v23, %v150_v62 }
 0x11a   :  { %v510_v40 = vmul.f32 %v509_v63, %v1412_v19  ;;  %vm1519_vm1 = vcmp.lt.f32.partialorder %v511_v3, 0.0004427343  ;;  %v504_v18 = vsel %vm1500_vm14, %v501_v10, %v498_v52  ;;  %vm166_vm2 = vcmp.ne.f32.partialorder %v1312_v47, %v1312_v47  ;;  %v804_v37 = vpop.eup %803 }
 0x11b   :  { %vm651_vm3 = vcmask 654912   ;;  %v631_v21 = vsel %vm630_vm9, %v629_v16, %v1468_v26  ;;  %v516_v4 = vmul.f32 0.6931472, %v802_v1  ;;  %v544_v14 = vmul.f32 -0.5, %v1472_v9  ;;  %v806_v53 = vpop.eup %805 }
 0x11c   :  { %v422_v19 = vsel %vm166_vm2, %v1312_v47, %v406_v6  ;;  %vm658_vm4 = vcmask 720512   ;;  %v513_v11 = vsel %vm1519_vm1, %v510_v40, %v507_v58  ;;  %v527_v8 = vadd.f32 1.0, %v526_v12 }
 0x11d   :  { %v529_v25 = vand.u32 2147483647, %v1454_v31  ;;  %v550_v28 = vadd.f32 1.0, %v422_v19  ;;  %v1661_v5 = vsub.s32 %v994_v43, %v959_v27  ;;  %v519_v26 = vmul.f32 %v518_v30, %v1440_v51  ;;  %v808_v50 = vpop.eup %807 }
 0x11e   :  { %vm1538_vm5 = vcmp.lt.f32.partialorder %v520_v2, 0.0004427343  ;;  %v536_v47 = vadd.f32 1.0, %v535_v48  ;;  %v525_v15 = vmul.f32 0.6931472, %v804_v37  ;;  %v562_v0 = vmul.f32 -0.5, %v1506_v7 }
 0x11f   :  { %v643_v61 = vrot.slane %v504_v18, %v1661_v5  ;;  %v538_v46 = vand.u32 2147483647, %v1478_v39  ;;  %811 = vlog2.f32 %v550_v28  ;;  %vm665_vm6 = vcmask 786112  }
 0x120   :  { %v522_v29 = vsel %vm1538_vm5, %v519_v26, %v516_v4  ;;  %v545_v43 = vadd.f32 1.0, %v544_v14  ;;  %v534_v17 = vmul.f32 0.6931472, %v806_v53  ;;  %v638_v51 = vsel %vm637_vm13, %v1465_v59, %v631_v21 }
 0x121   :  { %v1664_v41 = vsub.s32 %v991_v42, %v959_v27  ;;  %v528_v24 = vmul.f32 %v527_v8, %v1454_v31  ;;  %vm1552_vm7 = vcmp.lt.f32.partialorder %v529_v25, 0.0004427343  ;;  %v547_v13 = vand.u32 2147483647, %v1472_v9 }
 0x122   :  { %v543_v3 = vmul.f32 0.6931472, %v808_v50  ;;  %v537_v32 = vmul.f32 %v536_v47, %v1478_v39  ;;  %v553_v63 = vmul.f32 -0.5, %v422_v19  ;;  %v645_v38 = vsel %vm644_vm15, %v643_v61, %v638_v51  ;;  %v810_v45 = vpop.eup %809 }
 0x123   :  { %v650_v36 = vrot.slane %v513_v11, %v1664_v41  ;;  %v531_v59 = vsel %vm1552_vm7, %v528_v24, %v525_v15  ;;  %v1667_v42 = vsub.s32 %v997_v44, %v959_v27  ;;  %vm1564_vm8 = vcmp.lt.f32.partialorder %v538_v46, 0.0004427343 }
 0x124   :  { %v563_v20 = vadd.f32 1.0, %v562_v0  ;;  %v546_v60 = vmul.f32 %v545_v43, %v1472_v9  ;;  %v540_v39 = vsel %vm1564_vm8, %v537_v32, %v534_v17  ;;  %v565_v49 = vand.u32 2147483647, %v1506_v7 }
 0x125   :  { %v657_v31 = vrot.slane %v522_v29, %v1667_v42  ;;  %v688_v54 = vadd.s32 4294967176, %v953_v22  ;;  %vm1573_vm9 = vcmp.lt.f32.partialorder %v547_v13, 0.0004427343  ;;  %v561_v44 = vmul.f32 0.6931472, %v810_v45 }
 0x126   :  { %v677_v10 = vsub.s32 %v1460_v55, %v959_v27  ;;  %v681_v62 = vadd.s32 4294967184, %v953_v22  ;;  %v554_v1 = vadd.f32 1.0, %v553_v63  ;;  %v549_v9 = vsel %vm1573_vm9, %v546_v60, %v543_v3 }
 0x127   :  { %v652_v58 = vsel %vm651_vm3, %v650_v36, %v645_v38  ;;  %v1672_v12 = vsub.s32 %v1016_v56, %v959_v27  ;;  %v564_v30 = vmul.f32 %v563_v20, %v1506_v7  ;;  %v556_v2 = vand.u32 2147483647, %v422_v19 }
 0x128   :  { %v659_v48 = vsel %vm658_vm4, %v657_v31, %v652_v58  ;;  %v1673_v55 = vsub.s32 %v1085_v34, %v959_v27  ;;  %vm566_vm10 = vcmp.lt.f32.partialorder %v565_v49, 0.0004427343  ;;  %vm672_vm11 = vcmask 851712  }
 0x129   :  { %v664_v23 = vrot.slane %v531_v59, %v1672_v12  ;;  %v691_v22 = vsub.s32 %v688_v54, %v959_v27  ;;  %v812_v40 = vpop.eup %811  ;;  %v567_v35 = vsel %vm566_vm10, %v564_v30, %v561_v44  ;;  %v684_v18 = vsub.s32 %v681_v62, %v959_v27 }
 0x12a   :  { %v671_v6 = vrot.slane %v540_v39, %v1673_v55  ;;  %v555_v37 = vmul.f32 %v554_v1, %v422_v19  ;;  %v552_v56 = vmul.f32 0.6931472, %v812_v40  ;;  %v678_v7 = vrot.slane %v549_v9, %v677_v10 }
 0x12b   :  { %v666_v21 = vsel %vm665_vm6, %v664_v23, %v659_v48  ;;  %vm557_vm12 = vcmp.lt.f32.partialorder %v556_v2, 0.0004427343  ;;  %vm679_vm13 = vcmask 917312   ;;  %vm686_vm14 = vcmask 982912  }
 0x12c   :  { %v673_v4 = vsel %vm672_vm11, %v671_v6, %v666_v21  ;;  %v558_v14 = vsel %vm557_vm12, %v555_v37, %v552_v56  ;;  %v692_v34 = vrot.slane %v567_v35, %v691_v22  ;;  %vm693_vm15 = vcmask 1048512  }
 0x12d   :  { %v685_v53 = vrot.slane %v558_v14, %v684_v18  ;;  %v680_v11 = vsel %vm679_vm13, %v678_v7, %v673_v4 }
 0x12f   :  { %v687_v8 = vsel %vm686_vm14, %v685_v53, %v680_v11 }
 0x130   :  { %v694_v25 = vsel %vm693_vm15, %v692_v34, %v687_v8 }
 0x131   :  { %696 = vst [vmem:[#allocation6] sm:$0x1] %v694_v25 }
 0x132   :  { %846 = shalt.err (!%p843_p12)
}
 0x133   :  { %s847_s7 = scalar_lea.hbm %s1609_s3, 16 }
 0x134   :  { %p848_p13 = scmp.ne.s32.totalorder %s1609_s3, %s847_s7  ;;  %p851_p0 = scmp.lt.u32.totalorder %s847_s7, %s1609_s3 }
 0x136   :  { %p853_p1 = pnand %p851_p0, %p848_p13 }
 0x138   :  { %856 = shalt.err (!%p853_p1)
}
 0x139   :  { %706 = dma.vmem_to_hbm [thread:$0]  %s704_s29, 16, %s1609_s3, [#allocation5]  }
 0x13a   :  { %859 = dma.done.wait [#allocation5], 16  }
 0x13b   :  { %860 = vsyncadd [#allocation5], 4294967280 }
 0x13c   :  { %710 = vsyncpa [#allocation4], 1 }
 0x13d   :  { %711 = vsyncpa [#allocation5], 1 }

</bundles_post_ra>
